<compile_context>
chip_gen: v7x
topology: tpu7x:2x2x1
jax: 0.10.0
libtpu: 0.0.40
codegen_flags: <defaults>
</compile_context>

<pallas_src>
import functools

import jax
import jax.numpy as jnp
from jax.experimental import pallas as pl
from jax.experimental.pallas import tpu as pltpu


def _median3x3_kernel(x_ref, o_ref, *, H, W):
    """x_ref / o_ref: (Tp, H*W) blocks of flattened channel planes."""
    HW = H * W
    x = x_ref[...]
    zero = jnp.zeros((), x.dtype)

    # Lane-index masks describing the zero-padded border (a handful of VPU ops,
    # computed once per block).
    lane = jax.lax.broadcasted_iota(jnp.int32, x.shape, 1)
    col = lane % W
    first_row = lane < W
    last_row = lane >= (HW - W)
    first_col = col == 0
    last_col = col == (W - 1)

    def nbr(v, shift, oob_mask):
        # Neighbor fetch = static lane roll (XLU) + zero fill at the border.
        return jnp.where(oob_mask, zero, pltpu.roll(v, shift=shift % HW, axis=1))

    # ---- vertical pass: sort the 3 values in each window column ----
    up = nbr(x, W, first_row)      # pixel one row above (0 on first row)
    dn = nbr(x, -W, last_row)      # pixel one row below (0 on last row)

    a = jnp.minimum(up, x)
    b = jnp.maximum(up, x)
    b2 = jnp.minimum(b, dn)
    hi = jnp.maximum(b, dn)        # column max
    lo = jnp.minimum(a, b2)        # column min
    mid = jnp.maximum(a, b2)       # column median

    def med3(p, q, r):
        return jnp.maximum(jnp.minimum(p, q), jnp.minimum(jnp.maximum(p, q), r))

    # ---- horizontal pass: exact median of the 3 sorted columns ----
    max_lo = jnp.maximum(jnp.maximum(nbr(lo, 1, first_col), lo), nbr(lo, -1, last_col))
    min_hi = jnp.minimum(jnp.minimum(nbr(hi, 1, first_col), hi), nbr(hi, -1, last_col))
    med_mid = med3(nbr(mid, 1, first_col), mid, nbr(mid, -1, last_col))

    o_ref[...] = med3(max_lo, med_mid, min_hi)


def median_blur_3x3(x, *, block_planes=None):
    """x: (B, C, H, W) float array -> (B, C, H, W) 3x3 median blur (zero padding)."""
    B, C, H, W = x.shape
    P = B * C
    HW = H * W
    itemsize = jnp.dtype(x.dtype).itemsize

    # TODO(synk): planes much larger than a few MiB (e.g. 4K frames) would need an
    # extra row-tiling grid axis with a 1-row halo to stay inside v7x's 64 MiB VMEM.

    if block_planes is None:
        # Aim for ~2 MiB input blocks (2x-buffered in+out ~= 8 MiB of VMEM), in
        # multiples of 8 planes to satisfy the (8, 128) sublane tiling rule.
        target_bytes = 2 * 1024 * 1024
        bp = max(8, (target_bytes // max(1, HW * itemsize)) // 8 * 8)
        block_planes = P if bp >= P else int(bp)
    block_planes = int(block_planes)

    xf = x.reshape(P, HW)  # metadata-only reshape, no extra HBM traffic
    grid = (pl.cdiv(P, block_planes),)

    kernel = functools.partial(_median3x3_kernel, H=H, W=W)
    out = pl.pallas_call(
        kernel,
        out_shape=jax.ShapeDtypeStruct((P, HW), x.dtype),
        grid=grid,
        in_specs=[pl.BlockSpec((block_planes, HW), lambda i: (i, 0))],
        out_specs=pl.BlockSpec((block_planes, HW), lambda i: (i, 0)),
        compiler_params=pltpu.CompilerParams(
            dimension_semantics=("parallel",),
            vmem_limit_bytes=32 * 1024 * 1024,
        ),
    )(xf)
    return out.reshape(B, C, H, W)


def _median_blur_3x3_ref(x):
    """Pure-JAX reference (same zero-pad + median semantics as kornia/torch)."""
    B, C, H, W = x.shape
    xp = jnp.pad(x, ((0, 0), (0, 0), (1, 1), (1, 1)))
    stacks = jnp.stack(
        [xp[:, :, dy:dy + H, dx:dx + W] for dy in range(3) for dx in range(3)],
        axis=2,
    )  # (B, C, 9, H, W)
    return jnp.sort(stacks, axis=2)[:, :, 4]  # 5th order statistic == torch.median


if __name__ == "__main__":
    key = jax.random.PRNGKey(0)
    x = jax.random.uniform(key, (2, 4, 16, 16), dtype=jnp.float32)

    y = median_blur_3x3(x)
    y = jax.block_until_ready(y)

    y_ref = _median_blur_3x3_ref(x)
    assert y.shape == (2, 4, 16, 16)
    assert jnp.allclose(y, y_ref, atol=1e-6), "mismatch vs reference median blur"

    print("KERNEL_OK")
</pallas_src>

<mosaic_0001>
module attributes {stable_mosaic.version = 11 : i64} {
  func.func @_median3x3_kernel(%arg0: i32, %arg1: memref<8x256xf32, #tpu.memory_space<vmem>>, %arg2: memref<8x256xf32, #tpu.memory_space<vmem>>) attributes {dimension_semantics = [#tpu.dimension_semantics<parallel>], iteration_bounds = array<i64: 1>, scalar_prefetch = 0 : i64, scratch_operands = 0 : i64, tpu.core_type = #tpu.core_type<tc>, window_params = [{transform_indices = @transform_0, window_bounds = array<i64: 8, 256>}, {transform_indices = @transform_1, window_bounds = array<i64: 8, 256>}]} {
    %c0 = arith.constant 0 : index
    %c0_0 = arith.constant 0 : index
    %0 = vector.load %arg1[%c0, %c0_0] : memref<8x256xf32, #tpu.memory_space<vmem>>, vector<8x256xf32>
    %1 = tpu.iota {dimensions = array<i32: 1>} : vector<8x256xi32>
    %c16_i32 = arith.constant 16 : i32
    %c0_i32 = arith.constant 0 : i32
    %2 = arith.cmpi eq, %c16_i32, %c0_i32 : i32
    %c1_i32 = arith.constant 1 : i32
    %3 = arith.select %2, %c1_i32, %c16_i32 : i32
    %4 = vector.broadcast %3 : i32 to vector<8x256xi32>
    %5 = arith.remsi %1, %4 : vector<8x256xi32>
    %c0_i32_1 = arith.constant 0 : i32
    %6 = vector.broadcast %c0_i32_1 : i32 to vector<8x256xi32>
    %7 = arith.cmpi ne, %5, %6 : vector<8x256xi32>
    %c0_i32_2 = arith.constant 0 : i32
    %8 = vector.broadcast %c0_i32_2 : i32 to vector<8x256xi32>
    %9 = arith.cmpi slt, %5, %8 : vector<8x256xi32>
    %c0_i32_3 = arith.constant 0 : i32
    %10 = arith.cmpi slt, %3, %c0_i32_3 : i32
    %11 = vector.broadcast %10 : i1 to vector<8x256xi1>
    %12 = vector.broadcast %11 : vector<8x256xi1> to vector<8x256xi1>
    %13 = arith.xori %9, %12 : vector<8x256xi1>
    %14 = arith.andi %13, %7 : vector<8x256xi1>
    %15 = vector.broadcast %3 : i32 to vector<8x256xi32>
    %16 = arith.addi %5, %15 : vector<8x256xi32>
    %17 = arith.select %14, %16, %5 : vector<8x256xi1>, vector<8x256xi32>
    %c16_i32_4 = arith.constant 16 : i32
    %18 = vector.broadcast %c16_i32_4 : i32 to vector<8x256xi32>
    %19 = arith.cmpi slt, %1, %18 : vector<8x256xi32>
    %c240_i32 = arith.constant 240 : i32
    %20 = vector.broadcast %c240_i32 : i32 to vector<8x256xi32>
    %21 = arith.cmpi sge, %1, %20 : vector<8x256xi32>
    %c0_i32_5 = arith.constant 0 : i32
    %22 = vector.broadcast %c0_i32_5 : i32 to vector<8x256xi32>
    %23 = arith.cmpi eq, %17, %22 : vector<8x256xi32>
    %c15_i32 = arith.constant 15 : i32
    %24 = vector.broadcast %c15_i32 : i32 to vector<8x256xi32>
    %25 = arith.cmpi eq, %17, %24 : vector<8x256xi32>
    %c16_i32_6 = arith.constant 16 : i32
    %26 = tpu.dynamic_rotate %0 by %c16_i32_6 dim 1 : vector<8x256xf32>, i32 -> vector<8x256xf32>
    %cst = arith.constant 0.000000e+00 : f32
    %27 = vector.broadcast %cst : f32 to vector<8x256xf32>
    %28 = arith.select %19, %27, %26 : vector<8x256xi1>, vector<8x256xf32>
    %c240_i32_7 = arith.constant 240 : i32
    %29 = tpu.dynamic_rotate %0 by %c240_i32_7 dim 1 : vector<8x256xf32>, i32 -> vector<8x256xf32>
    %cst_8 = arith.constant 0.000000e+00 : f32
    %30 = vector.broadcast %cst_8 : f32 to vector<8x256xf32>
    %31 = arith.select %21, %30, %29 : vector<8x256xi1>, vector<8x256xf32>
    %32 = arith.minimumf %28, %0 : vector<8x256xf32>
    %33 = arith.maximumf %28, %0 : vector<8x256xf32>
    %34 = arith.minimumf %33, %31 : vector<8x256xf32>
    %35 = arith.maximumf %33, %31 : vector<8x256xf32>
    %36 = arith.minimumf %32, %34 : vector<8x256xf32>
    %37 = arith.maximumf %32, %34 : vector<8x256xf32>
    %c1_i32_9 = arith.constant 1 : i32
    %38 = tpu.dynamic_rotate %36 by %c1_i32_9 dim 1 : vector<8x256xf32>, i32 -> vector<8x256xf32>
    %cst_10 = arith.constant 0.000000e+00 : f32
    %39 = vector.broadcast %cst_10 : f32 to vector<8x256xf32>
    %40 = arith.select %23, %39, %38 : vector<8x256xi1>, vector<8x256xf32>
    %41 = arith.maximumf %40, %36 : vector<8x256xf32>
    %c255_i32 = arith.constant 255 : i32
    %42 = tpu.dynamic_rotate %36 by %c255_i32 dim 1 : vector<8x256xf32>, i32 -> vector<8x256xf32>
    %cst_11 = arith.constant 0.000000e+00 : f32
    %43 = vector.broadcast %cst_11 : f32 to vector<8x256xf32>
    %44 = arith.select %25, %43, %42 : vector<8x256xi1>, vector<8x256xf32>
    %45 = arith.maximumf %41, %44 : vector<8x256xf32>
    %c1_i32_12 = arith.constant 1 : i32
    %46 = tpu.dynamic_rotate %35 by %c1_i32_12 dim 1 : vector<8x256xf32>, i32 -> vector<8x256xf32>
    %cst_13 = arith.constant 0.000000e+00 : f32
    %47 = vector.broadcast %cst_13 : f32 to vector<8x256xf32>
    %48 = arith.select %23, %47, %46 : vector<8x256xi1>, vector<8x256xf32>
    %49 = arith.minimumf %48, %35 : vector<8x256xf32>
    %c255_i32_14 = arith.constant 255 : i32
    %50 = tpu.dynamic_rotate %35 by %c255_i32_14 dim 1 : vector<8x256xf32>, i32 -> vector<8x256xf32>
    %cst_15 = arith.constant 0.000000e+00 : f32
    %51 = vector.broadcast %cst_15 : f32 to vector<8x256xf32>
    %52 = arith.select %25, %51, %50 : vector<8x256xi1>, vector<8x256xf32>
    %53 = arith.minimumf %49, %52 : vector<8x256xf32>
    %c1_i32_16 = arith.constant 1 : i32
    %54 = tpu.dynamic_rotate %37 by %c1_i32_16 dim 1 : vector<8x256xf32>, i32 -> vector<8x256xf32>
    %cst_17 = arith.constant 0.000000e+00 : f32
    %55 = vector.broadcast %cst_17 : f32 to vector<8x256xf32>
    %56 = arith.select %23, %55, %54 : vector<8x256xi1>, vector<8x256xf32>
    %c255_i32_18 = arith.constant 255 : i32
    %57 = tpu.dynamic_rotate %37 by %c255_i32_18 dim 1 : vector<8x256xf32>, i32 -> vector<8x256xf32>
    %cst_19 = arith.constant 0.000000e+00 : f32
    %58 = vector.broadcast %cst_19 : f32 to vector<8x256xf32>
    %59 = arith.select %25, %58, %57 : vector<8x256xi1>, vector<8x256xf32>
    %60 = arith.minimumf %56, %37 : vector<8x256xf32>
    %61 = arith.maximumf %56, %37 : vector<8x256xf32>
    %62 = arith.minimumf %61, %59 : vector<8x256xf32>
    %63 = arith.maximumf %60, %62 : vector<8x256xf32>
    %64 = arith.minimumf %45, %63 : vector<8x256xf32>
    %65 = arith.maximumf %45, %63 : vector<8x256xf32>
    %66 = arith.minimumf %65, %53 : vector<8x256xf32>
    %67 = arith.maximumf %64, %66 : vector<8x256xf32>
    %c0_20 = arith.constant 0 : index
    %c0_21 = arith.constant 0 : index
    %68 = vector.load %arg2[%c0_20, %c0_21] : memref<8x256xf32, #tpu.memory_space<vmem>>, vector<8x256xf32>
    tpu.vector_store %arg2[%c0_20, %c0_21], %67 {strides = array<i32>} : memref<8x256xf32, #tpu.memory_space<vmem>>, vector<8x256xf32>,
    return
  }
  func.func @transform_0(%arg0: i32) -> (i32, i32) {
    %c0_i32 = arith.constant 0 : i32
    %c0_i32_0 = arith.constant 0 : i32
    return %arg0, %c0_i32 : i32, i32
  }
  func.func @transform_1(%arg0: i32) -> (i32, i32) {
    %c0_i32 = arith.constant 0 : i32
    %c0_i32_0 = arith.constant 0 : i32
    return %arg0, %c0_i32 : i32, i32
  }
}

</mosaic_0001>

<bundles_post_ra>
// kernel: tpu_custom_call.1
= control target key start
LH: loop header
LB: loop body
LE: loop exit
PB: predicated region body
PF: predicated region fallthrough
CT: control target
= control target key end

     0   :  { %6 = vsyncpa [#allocation3], 0  ;;  %s354_s0 = inlined_call_operand.hbm [shape: f32[8,256], index: 0, kind: input, shape index: {}]   ;;  %s355_s1 = inlined_call_operand.hbm [shape: f32[8,256], index: 1, kind: output, shape index: {}]  }
   0x1   :  { %7 = vsyncpa [#allocation4], 0  ;;  %s232_s6 = smov [#allocation2]   ;;  %s184_s10 = scalar_lea.hbm %s354_s0, 256 }
   0x2   :  { %s14_s7 = sshll.u32 %s232_s6, 4  ;;  %p185_p0 = scmp.ne.s32.totalorder %s354_s0, %s184_s10  ;;  %s15_s7 = int_to_ptr.vmem [resolvable:$true] %s14_s7 }
   0x3   :  { %p188_p1 = scmp.lt.u32.totalorder %s184_s10, %s354_s0 }
   0x5   :  { %p190_p2 = pnand %p188_p1, %p185_p0 }
   0x7   :  { %193 = shalt.err (!%p190_p2)
}
   0x8   :  { %s194_s15 = scalar_lea.vmem %s15_s7, 256  ;;  %p199_p4 = scmp.lt.s32.totalorder %s15_s7, %s15_s7 }
   0x9   :  { %p195_p3 = scmp.ne.s32.totalorder %s15_s7, %s194_s15  ;;  %p200_p5 = scmp.lt.s32.totalorder %s194_s15, %s194_s15 }
   0xb   :  { %p201_p6 = por %p200_p5, %p199_p4 }
   0xd   :  { %p202_p7 = pnand %p201_p6, %p195_p3 }
   0xf   :  { %205 = shalt.err (!%p202_p7)
}
  0x10   :  { %17 = dma.hbm_to_vmem [thread:$0]  %s354_s0, 256, %s15_s7, [#allocation3]  }
  0x11   :  { %228 = dma.done.wait [#allocation3], 256  }
  0x12   :  { %229 = vsyncadd [#allocation3], 4294967040  ;;  %v21_v0 = vld [vmem:[#allocation2] sm:$0xff]  ;;  %s233_s18 = smov 112   ;;  %s234_s19 = smov 16   ;;  %v22_v1 = vld [vmem:[#allocation2 + $0x8] sm:$0xff]  ;;  %v23_v2 = vlaneseq }
  0x13   :  { %66 = vrot.lane.b32.xlu1 %v21_v0, %s233_s18  ;;  %58 = vrot.lane.b32.xlu0 %v21_v0, %s234_s19  ;;  %s235_s0 = smov 1   ;;  %s236_s20 = smov 127  }
  0x14   :  { %v260_v3 = vand.u32 127, %v23_v2  ;;  %s237_s21 = smov [#allocation5]  }
  0x15   :  { %s169_s22 = sshll.u32 %s237_s21, 4  ;;  %s170_s22 = int_to_ptr.vmem [resolvable:$true] %s169_s22 }
  0x16   :  { %v25_v4 = vadd.s32 128, %v260_v3  ;;  %vm70_vm0 = vcmp.lt.s32.totalorder %v260_v3, 112  ;;  %vm50_vm1 = vcmp.lt.s32.totalorder %v260_v3, 16  ;;  %v30_v31 = vand.u32 15, %v260_v3  ;;  %s206_s23 = scalar_lea.vmem %s170_s22, 256  ;;  %p211_p9 = scmp.lt.s32.totalorder %s170_s22, %s170_s22 }
  0x17   :  { %68 = vrot.lane.b32.xlu1 %v22_v1, %s233_s18  ;;  %60 = vrot.lane.b32.xlu0 %v22_v1, %s234_s19  ;;  %vm91_vm3 = vcmp.lt.s32.totalorder %v260_v3, 1  ;;  %vm102_vm4 = vcmp.lt.s32.totalorder %v260_v3, 127  ;;  %p207_p8 = scmp.ne.s32.totalorder %s170_s22, %s206_s23  ;;  %p212_p10 = scmp.lt.s32.totalorder %s206_s23, %s206_s23 }
  0x18   :  { %vm53_vm2 = vcmp.ge.s32.totalorder %v25_v4, 240  ;;  %v37_v32 = vand.u32 15, %v25_v4  ;;  %vm284_vm5 = vcmp.eq.s32.totalorder %v30_v31, 0  ;;  %vm292_vm7 = vcmp.eq.s32.totalorder %v30_v31, 15 }
  0x19   :  { %p213_p11 = por %p212_p10, %p211_p9 }
  0x1a   :  { %vm288_vm6 = vcmp.eq.s32.totalorder %v37_v32, 0  ;;  %vm296_vm8 = vcmp.eq.s32.totalorder %v37_v32, 15 }
  0x1b   :  { %p214_p12 = pnand %p213_p11, %p207_p8 }
  0x85   :  { %v67_v5 = vpop.permute.xlu1 %66  ;;  %v59_v6 = vpop.permute.xlu0 %58 }
  0x89   :  { %v69_v7 = vpop.permute.xlu1 %68  ;;  %v61_v8 = vpop.permute.xlu0 %60 }
  0x8a   :  { %v72_v9 = vsel %vm70_vm0, %v69_v7, %v67_v5  ;;  %v62_v10 = vsel %vm50_vm1, %v59_v6, %v61_v8  ;;  %v63_v11 = vsel %vm50_vm1, %v61_v8, %v59_v6  ;;  %v71_v16 = vsel %vm70_vm0, %v67_v5, %v69_v7 }
  0x8b   :  { %v74_v12 = vsel %vm53_vm2, 0.0, %v72_v9  ;;  %v64_v13 = vsel %vm50_vm1, 0.0, %v63_v11  ;;  %v78_v14 = vmax.f32 %v62_v10, %v22_v1  ;;  %v76_v21 = vmin.f32 %v62_v10, %v22_v1 }
  0x8c   :  { %v77_v15 = vmax.f32 %v64_v13, %v21_v0  ;;  %v75_v22 = vmin.f32 %v64_v13, %v21_v0 }
  0x8d   :  { %v80_v17 = vmin.f32 %v78_v14, %v74_v12  ;;  %v265_v18 = vmax.f32 %v78_v14, %v74_v12 }
  0x8e   :  { %v79_v19 = vmin.f32 %v77_v15, %v71_v16  ;;  %v267_v20 = vmax.f32 %v77_v15, %v71_v16 }
  0x8f   :  { %111 = vrot.lane.b32.xlu1 %v265_v18, %s235_s0  ;;  %v271_v23 = vmax.f32 %v76_v21, %v80_v17  ;;  %v84_v25 = vmin.f32 %v76_v21, %v80_v17 }
  0x90   :  { %109 = vrot.lane.b32.xlu0 %v267_v20, %s235_s0  ;;  %v273_v24 = vmax.f32 %v75_v22, %v79_v19  ;;  %v83_v26 = vmin.f32 %v75_v22, %v79_v19 }
  0x93   :  { %131 = vrot.lane.b32.xlu1 %v271_v23, %s235_s0 }
  0x94   :  { %129 = vrot.lane.b32.xlu0 %v273_v24, %s235_s0 }
  0x97   :  { %89 = vrot.lane.b32.xlu1 %v84_v25, %s235_s0 }
  0x98   :  { %87 = vrot.lane.b32.xlu0 %v83_v26, %s235_s0 }
  0x9b   :  { %139 = vrot.lane.b32.xlu1 %v271_v23, %s236_s20 }
  0x9c   :  { %137 = vrot.lane.b32.xlu0 %v273_v24, %s236_s20 }
  0x9f   :  { %100 = vrot.lane.b32.xlu1 %v84_v25, %s236_s20 }
  0xa0   :  { %98 = vrot.lane.b32.xlu0 %v83_v26, %s236_s20 }
  0xa3   :  { %121 = vrot.lane.b32.xlu1 %v265_v18, %s236_s20 }
  0xa4   :  { %119 = vrot.lane.b32.xlu0 %v267_v20, %s236_s20 }
 0x101   :  { %v112_v27 = vpop.permute.xlu1 %111 }
 0x102   :  { %v110_v28 = vpop.permute.xlu0 %109 }
 0x103   :  { %v113_v42 = vsel %vm91_vm3, %v110_v28, %v112_v27  ;;  %v114_v43 = vsel %vm91_vm3, %v112_v27, %v110_v28 }
 0x104   :  { %v115_v56 = vsel %vm284_vm5, 0.0, %v114_v43  ;;  %v116_v57 = vsel %vm288_vm6, 0.0, %v113_v42 }
 0x105   :  { %v132_v29 = vpop.permute.xlu1 %131  ;;  %v117_v12 = vmin.f32 %v115_v56, %v267_v20  ;;  %v118_v13 = vmin.f32 %v116_v57, %v265_v18 }
 0x106   :  { %v130_v30 = vpop.permute.xlu0 %129 }
 0x107   :  { %v133_v35 = vsel %vm91_vm3, %v130_v30, %v132_v29  ;;  %v134_v36 = vsel %vm91_vm3, %v132_v29, %v130_v30 }
 0x108   :  { %v135_v47 = vsel %vm284_vm5, 0.0, %v134_v36  ;;  %v136_v48 = vsel %vm288_vm6, 0.0, %v133_v35 }
 0x109   :  { %v90_v33 = vpop.permute.xlu1 %89  ;;  %v147_v58 = vmax.f32 %v135_v47, %v273_v24  ;;  %v148_v59 = vmax.f32 %v136_v48, %v271_v23  ;;  %v145_v7 = vmin.f32 %v135_v47, %v273_v24  ;;  %v146_v8 = vmin.f32 %v136_v48, %v271_v23 }
 0x10a   :  { %v88_v34 = vpop.permute.xlu0 %87 }
 0x10b   :  { %v92_v39 = vsel %vm91_vm3, %v88_v34, %v90_v33  ;;  %v93_v40 = vsel %vm91_vm3, %v90_v33, %v88_v34 }
 0x10c   :  { %v94_v51 = vsel %vm284_vm5, 0.0, %v93_v40  ;;  %v95_v52 = vsel %vm288_vm6, 0.0, %v92_v39 }
 0x10d   :  { %v140_v41 = vpop.permute.xlu1 %139  ;;  %v96_v61 = vmax.f32 %v94_v51, %v83_v26  ;;  %v97_v62 = vmax.f32 %v95_v52, %v84_v25 }
 0x10e   :  { %v138_v46 = vpop.permute.xlu0 %137 }
 0x10f   :  { %v141_v49 = vsel %vm102_vm4, %v138_v46, %v140_v41  ;;  %v142_v50 = vsel %vm102_vm4, %v140_v41, %v138_v46 }
 0x110   :  { %v143_v53 = vsel %vm292_vm7, 0.0, %v141_v49  ;;  %v144_v54 = vsel %vm296_vm8, 0.0, %v142_v50 }
 0x111   :  { %v101_v55 = vpop.permute.xlu1 %100  ;;  %v149_v1 = vmin.f32 %v147_v58, %v143_v53  ;;  %v150_v2 = vmin.f32 %v148_v59, %v144_v54 }
 0x112   :  { %v99_v60 = vpop.permute.xlu0 %98 }
 0x113   :  { %v103_v63 = vsel %vm102_vm4, %v99_v60, %v101_v55  ;;  %v104_v0 = vsel %vm102_vm4, %v101_v55, %v99_v60  ;;  %v151_v14 = vmax.f32 %v145_v7, %v149_v1  ;;  %v152_v15 = vmax.f32 %v146_v8, %v150_v2 }
 0x114   :  { %v105_v4 = vsel %vm292_vm7, 0.0, %v103_v63  ;;  %v106_v5 = vsel %vm296_vm8, 0.0, %v104_v0 }
 0x115   :  { %v122_v6 = vpop.permute.xlu1 %121  ;;  %v107_v9 = vmax.f32 %v96_v61, %v105_v4  ;;  %v108_v10 = vmax.f32 %v97_v62, %v106_v5 }
 0x116   :  { %v120_v11 = vpop.permute.xlu0 %119 }
 0x117   :  { %v123_v16 = vsel %vm102_vm4, %v120_v11, %v122_v6  ;;  %v124_v17 = vsel %vm102_vm4, %v122_v6, %v120_v11  ;;  %v155_v22 = vmax.f32 %v107_v9, %v151_v14  ;;  %v156_v23 = vmax.f32 %v108_v10, %v152_v15 }
 0x118   :  { %v125_v19 = vsel %vm292_vm7, 0.0, %v123_v16  ;;  %v126_v21 = vsel %vm296_vm8, 0.0, %v124_v17  ;;  %v153_v18 = vmin.f32 %v107_v9, %v151_v14  ;;  %v154_v25 = vmin.f32 %v108_v10, %v152_v15 }
 0x119   :  { %v127_v24 = vmin.f32 %v117_v12, %v125_v19  ;;  %v128_v20 = vmin.f32 %v118_v13, %v126_v21 }
 0x11b   :  { %v157_v26 = vmin.f32 %v155_v22, %v127_v24  ;;  %v158_v27 = vmin.f32 %v156_v23, %v128_v20 }
 0x11d   :  { %v159_v28 = vmax.f32 %v153_v18, %v157_v26  ;;  %v160_v29 = vmax.f32 %v154_v25, %v158_v27 }
 0x11f   :  { %161 = vst [vmem:[#allocation5] sm:$0xff] %v159_v28  ;;  %162 = vst [vmem:[#allocation5 + $0x8] sm:$0xff] %v160_v29 }
 0x120   :  { %217 = shalt.err (!%p214_p12)
}
 0x121   :  { %s218_s26 = scalar_lea.hbm %s355_s1, 256 }
 0x122   :  { %p219_p13 = scmp.ne.s32.totalorder %s355_s1, %s218_s26  ;;  %p222_p0 = scmp.lt.u32.totalorder %s218_s26, %s355_s1 }
 0x124   :  { %p224_p1 = pnand %p222_p0, %p219_p13 }
 0x126   :  { %227 = shalt.err (!%p224_p1)
}
 0x127   :  { %172 = dma.vmem_to_hbm [thread:$0]  %s170_s22, 256, %s355_s1, [#allocation4]  }
 0x128   :  { %230 = dma.done.wait [#allocation4], 256  }
 0x129   :  { %231 = vsyncadd [#allocation4], 4294967040 }
 0x12a   :  { %176 = vsyncpa [#allocation3], 1 }
 0x12b   :  { %177 = vsyncpa [#allocation4], 1 }

</bundles_post_ra>
